<compile_context>
chip_gen: v7x
topology: tpu7x:2x2x1
jax: 0.10.0
libtpu: 0.0.40
codegen_flags: <defaults>
</compile_context>

<pallas_src>
import math

import jax
import jax.numpy as jnp
from jax.experimental import pallas as pl
from jax.experimental.pallas import tpu as pltpu


def _linear_kernel(x_ref, w_ref, b_ref, o_ref):
    # x_ref: (tm, K)   w_ref: (K, tn)   b_ref: (1, tn)   o_ref: (tm, tn)
    acc = jnp.dot(x_ref[...], w_ref[...], preferred_element_type=jnp.float32)
    o_ref[...] = (acc + b_ref[...]).astype(o_ref.dtype)
    # v2 = torch.clamp(v1, min, max) is computed in the torch module but its
    # result is discarded (forward returns v1), so it is omitted here.


def _round_up(x, m):
    return ((x + m - 1) // m) * m


def linear_forward(x, weight_t, bias, *, max_tm=512, max_tn=512):
    """x: (..., K) float32. weight_t: (K, N). bias: (N,). Returns (..., N)."""
    K, N = weight_t.shape
    lead = x.shape[:-1]
    M = math.prod(lead) if lead else 1
    x2 = x.reshape(M, K)          # free (metadata only)
    b2 = bias.reshape(1, N)       # free (metadata only)

    # Row tile: whole problem in one M-step when small (rounded up to the
    # sublane multiple), 512-row tiles otherwise. Column tile: 512 lanes so
    # the N axis splits into 2 parallel tiles (keeps both v7x TensorCores
    # busy). No array padding anywhere -- Pallas masks ragged edge blocks,
    # and rows/columns are independent so edge garbage never reaches valid
    # outputs.
    tm = max(8, _round_up(M, 8)) if M <= max_tm else max_tm
    tn = min(max_tn, _round_up(N, 128))
    grid_m = pl.cdiv(M, tm)
    grid_n = pl.cdiv(N, tn)

    cost = pl.CostEstimate(
        flops=2 * M * K * N,
        transcendentals=0,
        bytes_accessed=4 * (M * K + K * N + N + M * N),
    )

    out = pl.pallas_call(
        _linear_kernel,
        out_shape=jax.ShapeDtypeStruct((M, N), jnp.float32),
        grid_spec=pltpu.PrefetchScalarGridSpec(
            num_scalar_prefetch=0,
            grid=(grid_m, grid_n),
            in_specs=[
                pl.BlockSpec((tm, K), lambda i, j: (i, 0)),   # x row tile (K = full dim)
                pl.BlockSpec((K, tn), lambda i, j: (0, j)),   # weight column tile
                pl.BlockSpec((1, tn), lambda i, j: (0, j)),   # bias column tile
            ],
            out_specs=pl.BlockSpec((tm, tn), lambda i, j: (i, j)),
        ),
        compiler_params=pltpu.CompilerParams(
            dimension_semantics=("parallel", "parallel"),
        ),
        cost_estimate=cost,
    )(x2, weight_t, b2)

    return out.reshape(*lead, N)


def model_forward(x1, min_value, max_value, weight_t, bias):
    v1 = linear_forward(x1, weight_t, bias)
    # v2 = jnp.clip(v1, min_value, max_value)   # discarded, as in the module
    return v1


if __name__ == "__main__":
    K_IN, N_OUT = 224, 1000  # fixed by nn.Linear(224, 1000)

    key = jax.random.PRNGKey(0)
    kx, kw, kb = jax.random.split(key, 3)

    # Small shapes consistent with the module: (..., 224) input.
    x1 = jax.random.normal(kx, (2, 4, 8, K_IN), dtype=jnp.float32)

    # Deterministic parameter init (uniform like torch's default Linear init).
    bound = 1.0 / (K_IN ** 0.5)
    weight = jax.random.uniform(kw, (N_OUT, K_IN), jnp.float32, -bound, bound)
    bias = jax.random.uniform(kb, (N_OUT,), jnp.float32, -bound, bound)
    weight_t = weight.T  # (K, N) for the kernel, prepared once at setup time

    out = model_forward(x1, -0.5, 0.5, weight_t, bias)
    out = jax.block_until_ready(out)

    # Reference check in plain JAX.
    ref = jnp.einsum("bchk,nk->bchn", x1, weight) + bias
    assert out.shape == (2, 4, 8, N_OUT)
    assert jnp.allclose(out, ref, atol=1e-4, rtol=1e-4)

    print("KERNEL_OK")
</pallas_src>

<mosaic_0001>
module attributes {stable_mosaic.version = 11 : i64} {
  func.func @_linear_kernel(%arg0: i32, %arg1: i32, %arg2: memref<64x224xf32, #tpu.memory_space<vmem>>, %arg3: memref<224x512xf32, #tpu.memory_space<vmem>>, %arg4: memref<1x512xf32, #tpu.memory_space<vmem>>, %arg5: memref<64x512xf32, #tpu.memory_space<vmem>>) attributes {dimension_semantics = [#tpu.dimension_semantics<parallel>, #tpu.dimension_semantics<parallel>], iteration_bounds = array<i64: 1, 2>, scalar_prefetch = 0 : i64, scratch_operands = 0 : i64, tpu.core_type = #tpu.core_type<tc>, window_params = [{transform_indices = @transform_0, window_bounds = array<i64: 64, 224>}, {transform_indices = @transform_1, window_bounds = array<i64: 224, 512>}, {transform_indices = @transform_2, window_bounds = array<i64: 1, 512>}, {transform_indices = @transform_3, window_bounds = array<i64: 64, 512>}]} {
    %c0 = arith.constant 0 : index
    %c0_0 = arith.constant 0 : index
    %0 = vector.load %arg2[%c0, %c0_0] : memref<64x224xf32, #tpu.memory_space<vmem>>, vector<64x224xf32>
    %c0_1 = arith.constant 0 : index
    %c0_2 = arith.constant 0 : index
    %1 = vector.load %arg3[%c0_1, %c0_2] : memref<224x512xf32, #tpu.memory_space<vmem>>, vector<224x512xf32>
    %cst = arith.constant dense<0.000000e+00> : vector<64x512xf32>
    %2 = tpu.matmul %0, %1, %cst {dimension_numbers = #tpu.dot_dimension_numbers<[1], [0], [0], [1], [0, 0, 1, 1], [], []>} : vector<64x224xf32>, vector<224x512xf32>, vector<64x512xf32> -> vector<64x512xf32>
    %c0_3 = arith.constant 0 : index
    %c0_4 = arith.constant 0 : index
    %3 = vector.load %arg4[%c0_3, %c0_4] : memref<1x512xf32, #tpu.memory_space<vmem>>, vector<1x512xf32>
    %4 = vector.broadcast %3 : vector<1x512xf32> to vector<64x512xf32>
    %5 = arith.addf %2, %4 : vector<64x512xf32>
    %c0_5 = arith.constant 0 : index
    %c0_6 = arith.constant 0 : index
    %6 = vector.load %arg5[%c0_5, %c0_6] : memref<64x512xf32, #tpu.memory_space<vmem>>, vector<64x512xf32>
    tpu.vector_store %arg5[%c0_5, %c0_6], %5 {strides = array<i32>} : memref<64x512xf32, #tpu.memory_space<vmem>>, vector<64x512xf32>,
    return
  }
  func.func @transform_0(%arg0: i32, %arg1: i32) -> (i32, i32) {
    %c0_i32 = arith.constant 0 : i32
    %c0_i32_0 = arith.constant 0 : i32
    return %arg0, %c0_i32 : i32, i32
  }
  func.func @transform_1(%arg0: i32, %arg1: i32) -> (i32, i32) {
    %c0_i32 = arith.constant 0 : i32
    %c0_i32_0 = arith.constant 0 : i32
    return %c0_i32, %arg1 : i32, i32
  }
  func.func @transform_2(%arg0: i32, %arg1: i32) -> (i32, i32) {
    %c0_i32 = arith.constant 0 : i32
    %c0_i32_0 = arith.constant 0 : i32
    return %c0_i32, %arg1 : i32, i32
  }
  func.func @transform_3(%arg0: i32, %arg1: i32) -> (i32, i32) {
    %c0_i32 = arith.constant 0 : i32
    return %arg0, %arg1 : i32, i32
  }
}

</mosaic_0001>

<bundles_post_ra>
// kernel: tpu_custom_call.1
= control target key start
LH: loop header
LB: loop body
LE: loop exit
PB: predicated region body
PF: predicated region fallthrough
CT: control target
= control target key end

     0   :  { %s1745_s0 = inlined_call_operand.hbm [shape: f32[64,224], index: 0, kind: input, shape index: {}]   ;;  %s1746_s1 = inlined_call_operand.hbm [shape: f32[224,1000], index: 1, kind: input, shape index: {}]   ;;  %s1747_s2 = inlined_call_operand.hbm [shape: f32[1,1000], index: 2, kind: input, shape index: {}]   ;;  %s1748_s3 = inlined_call_operand.hbm [shape: f32[64,1000], index: 3, kind: output, shape index: {}]  }
   0x1   :  { %1757 = sst [smem:[#allocation13_spill]] %s1746_s1 }
   0x2   :  { %8 = vsyncpa [#allocation3], 0 }
   0x3   :  { %9 = vsyncpa [#allocation6], 0 }
   0x4   :  { %11 = vsyncpa [#allocation6 + $0x1], 0 }
   0x5   :  { %12 = vsyncpa [#allocation4], 0 }
   0x6   :  { %14 = vsyncpa [#allocation4 + $0x1], 0  ;;  %s1281_s12 = smov 0   ;;  %s1283_s13 = smov 0  }
   0x7   :  { %s1285_s14 = smov 0   ;;  %s1287_s15 = smov 0  }
   0x8   :  { %s1289_s16 = smov 0   ;;  %s1291_s17 = smov 0  }
   0x9 LB: > { %s29_s18 = sadd.s32 1, %s1243_s16  ;;  %s65_s19 = sadd.s32 1, %s1235_s14  ;;  %s1247_s17 = sphi %s1291_s17, %s20_s17   ;;  %s1243_s16 = sphi %s1289_s16, %s1781_s16   ;;  %s1239_s15 = sphi %s1287_s15, %s1780_s15   ;;  %s1235_s14 = sphi %s1285_s14, %s1779_s14   ;;  %s1231_s13 = sphi %s1283_s13, %s1778_s13   ;;  %s1227_s12 = sphi %s1281_s12, %s1777_s12  }
   0xa   : > { %p30_p0 = scmp.ge.s32.totalorder %s29_s18, 2  ;;  %p72_p1 = scmp.ne.s32.totalorder %s1235_s14, %s1231_s13 }
   0xb   : > { %p73_p2 = scmp.eq.s32.totalorder %s1247_s17, 0  ;;  %p1013_p5 = scmp.lt.s32.totalorder %s1247_s17, 2 }
   0xc   : > { %s1783_s18 = smov (%p30_p0, %s29_s18), 0  ;;  %s173_s21 = sand.u32 1, %s1247_s17  }
   0xd   : > { %1758 = sst [smem:[#allocation12_spill]] %s1783_s18  ;;  %p74_p4 = por %p73_p2, %p72_p1 }
   0xe   : > { %s62_s20 = ssub.s32 %s1243_s16, %s1783_s18  ;;  %s175_s22 = sand.u32 1, %s1235_s14  }
   0xf   : > { %p63_p6 = scmp.eq.s32.totalorder %s62_s20, 0  ;;  %s870_s23 = sshll.u32 %s1243_s16, 9 }
  0x10   : > { %s985_s25 = smul.u32 896, %s175_s22  ;;  %s1759_s1 = sld [smem:[#allocation13_spill]] }
  0x11   : > { %s1329_s24 = scalar_select %p63_p6, %s1235_s14, %s65_s19  }
  0x12   : > { %p1338_p7 = pnand %p1013_p5, %p74_p4  ;;  %s177_s30 = scalar_lea.vmem [#allocation5], %s985_s25 }
  0x13   : > { %s184_s4 = sshll.u32 %s177_s30, 4  ;;  %s1344_s5 = scalar_lea.sflag [#allocation6], %s173_s21  ;;  %s1342_s4 = int_to_ptr.vmem [resolvable:$true] %s184_s4 }
  0x14   : > { %s1760_s29 = scalar_select %p1338_p7, 1, 0 }
  0x15   : > { %p1751_p9 = pneg %p1338_p7 }
  0x16   : > { %s1336_s28 = scalar_lea.hbm %s1759_s1, %s870_s23  ;;  %s1078_s9 = scalar_lea.hbm %s1759_s1, 28672 }
  0x17   : > { %s1073_s6 = scalar_lea.hbm %s1336_s28, 14336  ;;  %p1079_p12 = scmp.lt.u32.totalorder %s1336_s28, %s1759_s1 }
  0x18   : > { %p1074_p8 = scmp.ne.s32.totalorder %s1336_s28, %s1073_s6  ;;  %p1080_p13 = scmp.lt.u32.totalorder %s1078_s9, %s1073_s6 }
  0x19   : > { %p1082_p2 = scmp.lt.u32.totalorder %s1073_s6, %s1336_s28 }
  0x1a   : > { %p1076_p10 = pnand %p1751_p9, %p1074_p8  ;;  %p1081_p0 = por %p1080_p13, %p1079_p12 }
  0x1c   : > { %p1077_p11 = pneg %p1076_p10  ;;  %p1083_p4 = por %p1082_p2, %p1081_p0 }
  0x1e   : > { %p1084_p5 = pnand %p1083_p4, %p1077_p11 }
  0x20   : > { %1087 = shalt.err (!%p1084_p5)
}
  0x21   : > { %s1088_s19 = scalar_lea.vmem %s1342_s4, 14336  ;;  %s1249_s20 = smov [#allocation5]  }
  0x22   : > { %p1089_p6 = scmp.ne.s32.totalorder %s1342_s4, %s1088_s19  ;;  %s1093_s21 = sshll.u32 %s1249_s20, 4  ;;  %s1094_s21 = int_to_ptr.vmem [resolvable:$false] %s1093_s21 }
  0x23   : > { %s1095_s23 = scalar_lea.vmem %s1094_s21, 28672  ;;  %p1096_p3 = scmp.lt.s32.totalorder %s1342_s4, %s1094_s21 }
  0x24   : > { %p1091_p8 = pnand %p1089_p6, %p1751_p9  ;;  %p1097_p12 = scmp.lt.s32.totalorder %s1095_s23, %s1088_s19 }
  0x26   : > { %p1092_p10 = pneg %p1091_p8  ;;  %p1098_p13 = por %p1097_p12, %p1096_p3 }
  0x28   : > { %p1099_p0 = pnand %p1098_p13, %p1092_p10 }
  0x2a   : > { %1102 = shalt.err (!%p1099_p0)
}
  0x2b   : > { %s1250_s25 = smov 1024   ;;  %s1251_s26 = smov 512  }
  0x2c   : > { %s1252_s27 = smov 32   ;;  %s1373_s30 = sadd.s32 4294967295, %s1247_s17  }
  0x2d   : > { %1004 = dma.hbm_to_vmem [thread:$0]  (!%p1338_p7), %s1336_s28, 14336, %s1342_s4, %s1344_s5, %s1250_s25, %s1251_s26, %s1252_s27  }
  0x2e   : > { %s836_s6 = sadd.s32 4294967294, %s1247_s17   ;;  %p78_p3 = scmp.ne.s32.totalorder %s1231_s13, %s1227_s12 }
  0x2f   : > { %p1750_p11 = scmp.eq.s32.totalorder %s1373_s30, 0  ;;  %p130_p2 = scmp.eq.s32.totalorder %s1373_s30, 1 }
  0x30   : > { %p136_p4 = scmp.eq.s32.totalorder %s836_s6, 1  ;;  %p837_p6 = scmp.ge.s32.totalorder %s1247_s17, 1 }
  0x31   : > { %p1382_p5 = por %p1750_p11, %p78_p3  ;;  %p1390_p8 = por %p130_p2, %p72_p1 }
  0x32   : > { %p1394_p10 = por %p136_p4, %p78_p3  ;;  %p143_p12 = scmp.lt.s32.totalorder %s1247_s17, 3 }
  0x33   : > { %s1761_s7 = scalar_select %p1382_p5, 1, 0 }
  0x34   : > { %s1762_s28 = scalar_select %p1390_p8, 1, 0 }
  0x35   : > { %s1763_s4 = scalar_select %p1394_p10, 1, 0 }
  0x36   : > { %p1399_p13 = pnand %p837_p6, %p143_p12  ;;  %s1253_s9 = smov [#allocation2]  }
  0x37   : > { %s159_s10 = sshll.u32 %s1253_s9, 4  ;;  %s842_s11 = sshll.u32 %s175_s22, 2  ;;  %s1403_s10 = int_to_ptr.vmem [resolvable:$true] %s159_s10 }
  0x38   : > { %s1764_s8 = scalar_select %p1399_p13, 1, 0 }
  0x39   : > { %p997_p0 = pneg %p1399_p13  ;;  %s871_s19 = sshll.u32 %s1243_s16, 6 }
  0x3a   : > { %s1419_s25 = scalar_lea.hbm %s1747_s2, %s871_s19  ;;  %s198_s26 = scalar_lea.vmem [#allocation7], %s842_s11 }
  0x3b   : > { %p1412_p1 = pnand %p997_p0, %p1750_p11  ;;  %s206_s27 = sshll.u32 %s198_s26, 4  ;;  %s1421_s27 = int_to_ptr.vmem [resolvable:$true] %s206_s27 }
  0x3c   : > { %s1103_s22 = scalar_lea.hbm %s1745_s0, 2048 }
  0x3d   : > { %p1104_p3 = scmp.ne.s32.totalorder %s1745_s0, %s1103_s22  ;;  %p1105_p2 = pneg %p1412_p1 }
  0x3e   : > { %p1110_p12 = scmp.lt.u32.totalorder %s1103_s22, %s1745_s0 }
  0x3f   : > { %p1106_p4 = pnand %p1105_p2, %p1104_p3 }
  0x41   : > { %p1107_p6 = pneg %p1106_p4 }
  0x43   : > { %p1112_p0 = pnand %p1110_p12, %p1107_p6 }
  0x45   : > { %1115 = shalt.err (!%p1112_p0)
}
  0x46   : > { %s1116_s11 = scalar_lea.vmem %s1403_s10, 2048  ;;  %p1124_p8 = scmp.lt.s32.totalorder %s1403_s10, %s1403_s10 }
  0x47   : > { %p1117_p11 = scmp.ne.s32.totalorder %s1403_s10, %s1116_s11  ;;  %p1125_p5 = scmp.lt.s32.totalorder %s1116_s11, %s1116_s11 }
  0x49   : > { %p1119_p9 = pnand %p1117_p11, %p1105_p2  ;;  %p1126_p13 = por %p1125_p5, %p1124_p8 }
  0x4b   : > { %p1120_p10 = pneg %p1119_p9 }
  0x4d   : > { %p1127_p7 = pnand %p1126_p13, %p1120_p10 }
  0x4f   : > { %1130 = shalt.err (!%p1127_p7)
}
  0x50   : > { %s1254_s1 = smov 256   ;;  %s1255_s18 = smov 16  }
  0x51   : > { %1000 = dma.hbm_to_vmem [thread:$0]  (!%p1412_p1), %s1745_s0, 2048, %s1403_s10, [#allocation3], %s1254_s1, %s1254_s1, %s1255_s18  }
  0x52   : > { %s1131_s6 = scalar_lea.hbm %s1419_s25, 64  ;;  %p1766_p11 = scmp.ne.s32.totalorder %s1760_s29, 0 }
  0x53   : > { %p1132_p9 = scmp.ne.s32.totalorder %s1419_s25, %s1131_s6  ;;  %s1136_s21 = scalar_lea.hbm %s1747_s2, 128 }
  0x54   : > { %p1767_p5 = pneg %p1766_p11  ;;  %p1137_p10 = scmp.lt.u32.totalorder %s1419_s25, %s1747_s2 }
  0x55   : > { %p1138_p13 = scmp.lt.u32.totalorder %s1136_s21, %s1131_s6  ;;  %p1140_p2 = scmp.lt.u32.totalorder %s1131_s6, %s1419_s25 }
  0x56   : > { %p1134_p8 = pnand %p1132_p9, %p1767_p5 }
  0x57   : > { %p1139_p3 = por %p1138_p13, %p1137_p10 }
  0x58   : > { %p1135_p7 = pneg %p1134_p8 }
  0x59   : > { %p1141_p4 = por %p1140_p2, %p1139_p3 }
  0x5b   : > { %p1142_p6 = pnand %p1141_p4, %p1135_p7 }
  0x5d   : > { %1145 = shalt.err (!%p1142_p6)
}
  0x5e   : > { %s1146_s10 = scalar_lea.vmem %s1421_s27, 64  ;;  %p1768_p12 = pmov %p1767_p5 }
  0x5f   : > { %p1147_p1 = scmp.ne.s32.totalorder %s1421_s27, %s1146_s10  ;;  %s1256_s20 = smov [#allocation7]  }
  0x60   : > { %s1151_s1 = sshll.u32 %s1256_s20, 4  ;;  %s1152_s1 = int_to_ptr.vmem [resolvable:$false] %s1151_s1 }
  0x61   : > { %p1149_p0 = pnand %p1147_p1, %p1768_p12  ;;  %s1153_s18 = scalar_lea.vmem %s1152_s1, 128 }
  0x62   : > { %p1154_p5 = scmp.lt.s32.totalorder %s1421_s27, %s1152_s1  ;;  %p1155_p8 = scmp.lt.s32.totalorder %s1153_s18, %s1146_s10 }
  0x63   : > { %p1150_p9 = pneg %p1149_p0 }
  0x64   : > { %p1156_p10 = por %p1155_p8, %p1154_p5 }
  0x66   : > { %p1157_p13 = pnand %p1156_p10, %p1150_p9 }
  0x68   : > { %1160 = shalt.err (!%p1157_p13)
}
  0x69   : > { %1007 = dma.hbm_to_vmem [thread:$0]  (!%p1766_p11), %s1419_s25, 64, %s1421_s27, %s1344_s5  }
  0x6a   : > { %p1769_p7 = scmp.ne.s32.totalorder %s1764_s8, 0 }
  0x6b   : > { %p1770_p3 = scmp.eq.s32.totalorder (!%p1769_p7), %s1373_s30, 0 }
  0x6c   : > { %215 = sbr.rel (%p1769_p7) target bundleno = 441 (0x1b9), region = 32 }
  0x73   : > { %1214 = dma.done.wait (%p1770_p3), [#allocation3], 2048   ;;  %p1771_p2 = pmov %p1770_p3 }
  0x74   : > { %s221_s19 = sand.u32 1, %s1373_s30   ;;  %s1476_s26 = sand.u32 1, %s1231_s13  }
  0x75   : > { %1216 = vsyncadd (%p1771_p2), [#allocation3], 4294965248  ;;  %s986_s29 = smul.u32 896, %s1476_s26  ;;  %s222_s6 = scalar_lea.sflag [#allocation6], %s221_s19 }
  0x76   : > { %p1772_p11 = scmp.ne.s32.totalorder %s1761_s7, 0 }
  0x77   : > { %s1479_s9 = scalar_lea.vmem [#allocation5], %s986_s29 }
  0x78   : > { %1218 = dma.done.wait (%p1772_p11), %s222_s6, 14400  }
  0x79   : > { %1220 = vsyncadd (%p1772_p11), %s222_s6, 4294952896  ;;  %v284_v0 = vld [vmem:[%s1479_s9 + $0x8] sm:$0xff]  ;;  %v286_v2 = vld [vmem:[%s1479_s9 + $0x18] sm:$0xff]  ;;  %vm417_vm0 = vcmask 785408   ;;  %s847_s5 = sshll.u32 %s1476_s26, 2  ;;  %s848_s7 = sshll.u32 %s1476_s26, 8 }
  0x7a   : > { %v288_v1 = vld [vmem:[%s1479_s9 + $0x28] sm:$0xff]  ;;  %v290_v4 = vld [vmem:[%s1479_s9 + $0x38] sm:$0xff]  ;;  %v283_v5 = vld [vmem:[%s1479_s9] sm:$0xff]  ;;  %s234_s30 = scalar_lea.vmem [#allocation7], %s847_s5  ;;  %s1626_s8 = scalar_lea.vmem [#allocation8], %s848_s7 }
  0x7b   : > { %v873_v3 = vpack.c.bf16 %v288_v1, %v284_v0  ;;  %v287_v6 = vld [vmem:[%s1479_s9 + $0x20] sm:$0xff]  ;;  %v929_v7 = vpack.c.bf16 %v290_v4, %v286_v2  ;;  %v285_v9 = vld [vmem:[%s1479_s9 + $0x10] sm:$0xff]  ;;  %v292_v11 = vld [vmem:[%s1479_s9 + $0x48] sm:$0xff]  ;;  %s872_s25 = sshll.u32 %s1239_s15, 9  ;;  %s717_s27 = sshll.u32 %s1626_s8, 4  ;;  %s1691_s27 = int_to_ptr.vmem [resolvable:$true] %s717_s27 }
  0x7c   : > { %v875_v8 = vpack.c.bf16 %v287_v6, %v283_v5  ;;  %v289_v10 = vld [vmem:[%s1479_s9 + $0x30] sm:$0xff]  ;;  %v296_v13 = vld [vmem:[%s1479_s9 + $0x68] sm:$0xff]  ;;  %v294_v14 = vld [vmem:[%s1479_s9 + $0x58] sm:$0xff]  ;;  %s1687_s21 = scalar_lea.hbm %s1748_s3, %s872_s25  ;;  %s701_s23 = scalar_lea.sflag [#allocation4], %s1476_s26 }
  0x7d   : > { %874 = vmatprep.subr.bf16.mxu0 %v873_v3  ;;  %v931_v12 = vpack.c.bf16 %v289_v10, %v285_v9  ;;  %v298_v15 = vld [vmem:[%s1479_s9 + $0x78] sm:$0xff]  ;;  %930 = vmatprep.subr.bf16.mxu1 %v929_v7  ;;  %v877_v16 = vpack.c.bf16 %v296_v13, %v292_v11  ;;  %v291_v18 = vld [vmem:[%s1479_s9 + $0x40] sm:$0xff]  ;;  %v293_v20 = vld [vmem:[%s1479_s9 + $0x50] sm:$0xff]  ;;  %s1161_s11 = scalar_lea.vmem %s1691_s27, 4096  ;;  %p1773_p6 = scmp.ne.s32.totalorder %s1762_s28, 0 }
  0x7e   : > { %876 = vmatpush1.bf16.msra.mxu0 %v875_v8  ;;  %v933_v17 = vpack.c.bf16 %v298_v15, %v294_v14  ;;  %v295_v19 = vld [vmem:[%s1479_s9 + $0x60] sm:$0xff]  ;;  %v297_v22 = vld [vmem:[%s1479_s9 + $0x70] sm:$0xff]  ;;  %v300_v23 = vld [vmem:[%s1479_s9 + $0x88] sm:$0xff]  ;;  %p1162_p4 = scmp.ne.s32.totalorder %s1691_s27, %s1161_s11  ;;  %s1257_s10 = smov [#allocation8]  }
  0x7f   : > { %932 = vmatpush1.bf16.msra.mxu1 %v931_v12  ;;  %v879_v21 = vpack.c.bf16 %v295_v19, %v291_v18  ;;  %v304_v24 = vld [vmem:[%s1479_s9 + $0xa8] sm:$0xff]  ;;  %878 = vmatprep.subr.bf16.mxu0 %v877_v16  ;;  %v935_v25 = vpack.c.bf16 %v297_v22, %v293_v20  ;;  %v302_v27 = vld [vmem:[%s1479_s9 + $0x98] sm:$0xff]  ;;  %v299_v29 = vld [vmem:[%s1479_s9 + $0x80] sm:$0xff]  ;;  %s1165_s20 = sshll.u32 %s1257_s10, 4  ;;  %s1166_s20 = int_to_ptr.vmem [resolvable:$false] %s1165_s20 }
  0x80   : > { %934 = vmatprep.subr.bf16.mxu1 %v933_v17  ;;  %v881_v26 = vpack.c.bf16 %v304_v24, %v300_v23  ;;  %v306_v28 = vld [vmem:[%s1479_s9 + $0xb8] sm:$0xff]  ;;  %v303_v31 = vld [vmem:[%s1479_s9 + $0xa0] sm:$0xff]  ;;  %v301_v32 = vld [vmem:[%s1479_s9 + $0x90] sm:$0xff]  ;;  %p1163_p1 = pnand %p1162_p4, %p1773_p6  ;;  %s1167_s1 = scalar_lea.vmem %s1166_s20, 8192 }
  0x81   : > { %v937_v30 = vpack.c.bf16 %v306_v28, %v302_v27  ;;  %v305_v33 = vld [vmem:[%s1479_s9 + $0xb0] sm:$0xff]  ;;  %v883_v34 = vpack.c.bf16 %v303_v31, %v299_v29  ;;  %v308_v35 = vld [vmem:[%s1479_s9 + $0xc8] sm:$0xff]  ;;  %v310_v37 = vld [vmem:[%s1479_s9 + $0xd8] sm:$0xff]  ;;  %p1168_p0 = scmp.lt.s32.totalorder %s1691_s27, %s1166_s20  ;;  %p1169_p9 = scmp.lt.s32.totalorder %s1167_s1, %s1161_s11 }
  0x82   : > { %880 = vmatpush1.bf16.msra.mxu0 %v879_v21  ;;  %v312_v36 = vld [vmem:[%s1479_s9 + $0xe8] sm:$0xff]  ;;  %v939_v38 = vpack.c.bf16 %v305_v33, %v301_v32  ;;  %v314_v40 = vld [vmem:[%s1479_s9 + $0xf8] sm:$0xff]  ;;  %v307_v41 = vld [vmem:[%s1479_s9 + $0xc0] sm:$0xff]  ;;  %p1164_p12 = pneg %p1163_p1 }
  0x83   : > { %936 = vmatpush1.bf16.msra.mxu1 %v935_v25  ;;  %882 = vmatprep.subr.bf16.mxu0 %v881_v26  ;;  %v885_v39 = vpack.c.bf16 %v312_v36, %v308_v35  ;;  %v311_v42 = vld [vmem:[%s1479_s9 + $0xe0] sm:$0xff]  ;;  %v941_v43 = vpack.c.bf16 %v314_v40, %v310_v37  ;;  %v309_v44 = vld [vmem:[%s1479_s9 + $0xd0] sm:$0xff]  ;;  %v316_v46 = vld [vmem:[%s1479_s9 + $0x108] sm:$0xff]  ;;  %p1170_p5 = por %p1169_p9, %p1168_p0 }
  0x84   : > { %938 = vmatprep.subr.bf16.mxu1 %v937_v30  ;;  %v313_v45 = vld [vmem:[%s1479_s9 + $0xf0] sm:$0xff]  ;;  %v320_v47 = vld [vmem:[%s1479_s9 + $0x128] sm:$0xff]  ;;  %v318_v48 = vld [vmem:[%s1479_s9 + $0x118] sm:$0xff]  ;;  %v887_v50 = vpack.c.bf16 %v311_v42, %v307_v41 }
  0x85   : > { %v322_v49 = vld [vmem:[%s1479_s9 + $0x138] sm:$0xff]  ;;  %v943_v51 = vpack.c.bf16 %v313_v45, %v309_v44  ;;  %v889_v52 = vpack.c.bf16 %v320_v47, %v316_v46  ;;  %v315_v53 = vld [vmem:[%s1479_s9 + $0x100] sm:$0xff]  ;;  %v317_v55 = vld [vmem:[%s1479_s9 + $0x110] sm:$0xff]  ;;  %p1171_p8 = pnand %p1170_p5, %p1164_p12 }
  0x86   : > { %884 = vmatpush1.bf16.msra.mxu0 %v883_v34  ;;  %v319_v54 = vld [vmem:[%s1479_s9 + $0x120] sm:$0xff]  ;;  %v945_v56 = vpack.c.bf16 %v322_v49, %v318_v48  ;;  %v321_v57 = vld [vmem:[%s1479_s9 + $0x130] sm:$0xff]  ;;  %v324_v58 = vld [vmem:[%s1479_s9 + $0x148] sm:$0xff] }
  0x87   : > { %940 = vmatpush1.bf16.msra.mxu1 %v939_v38  ;;  %886 = vmatprep.subr.bf16.mxu0 %v885_v39  ;;  %v328_v59 = vld [vmem:[%s1479_s9 + $0x168] sm:$0xff]  ;;  %v326_v60 = vld [vmem:[%s1479_s9 + $0x158] sm:$0xff]  ;;  %v891_v62 = vpack.c.bf16 %v319_v54, %v315_v53  ;;  %v947_v63 = vpack.c.bf16 %v321_v57, %v317_v55  ;;  %v323_v1 = vld [vmem:[%s1479_s9 + $0x140] sm:$0xff] }
  0x88   : > { %942 = vmatprep.subr.bf16.mxu1 %v941_v43  ;;  %v330_v61 = vld [vmem:[%s1479_s9 + $0x178] sm:$0xff]  ;;  %v893_v0 = vpack.c.bf16 %v328_v59, %v324_v58  ;;  %v327_v2 = vld [vmem:[%s1479_s9 + $0x160] sm:$0xff]  ;;  %v325_v3 = vld [vmem:[%s1479_s9 + $0x150] sm:$0xff] }
  0x89   : > { %v949_v4 = vpack.c.bf16 %v330_v61, %v326_v60  ;;  %v329_v5 = vld [vmem:[%s1479_s9 + $0x170] sm:$0xff]  ;;  %v332_v6 = vld [vmem:[%s1479_s9 + $0x188] sm:$0xff]  ;;  %v334_v8 = vld [vmem:[%s1479_s9 + $0x198] sm:$0xff]  ;;  %v895_v10 = vpack.c.bf16 %v327_v2, %v323_v1 }
  0x8a   : > { %888 = vmatpush1.bf16.msra.mxu0 %v887_v50  ;;  %v336_v7 = vld [vmem:[%s1479_s9 + $0x1a8] sm:$0xff]  ;;  %v338_v9 = vld [vmem:[%s1479_s9 + $0x1b8] sm:$0xff]  ;;  %v951_v11 = vpack.c.bf16 %v329_v5, %v325_v3  ;;  %v331_v13 = vld [vmem:[%s1479_s9 + $0x180] sm:$0xff] }
  0x8b   : > { %944 = vmatpush1.bf16.msra.mxu1 %v943_v51  ;;  %890 = vmatprep.subr.bf16.mxu0 %v889_v52  ;;  %v897_v12 = vpack.c.bf16 %v336_v7, %v332_v6  ;;  %v335_v14 = vld [vmem:[%s1479_s9 + $0x1a0] sm:$0xff]  ;;  %v333_v15 = vld [vmem:[%s1479_s9 + $0x190] sm:$0xff]  ;;  %v953_v16 = vpack.c.bf16 %v338_v9, %v334_v8  ;;  %v340_v18 = vld [vmem:[%s1479_s9 + $0x1c8] sm:$0xff] }
  0x8c   : > { %946 = vmatprep.subr.bf16.mxu1 %v945_v56  ;;  %v337_v17 = vld [vmem:[%s1479_s9 + $0x1b0] sm:$0xff]  ;;  %v344_v19 = vld [vmem:[%s1479_s9 + $0x1e8] sm:$0xff]  ;;  %v342_v20 = vld [vmem:[%s1479_s9 + $0x1d8] sm:$0xff]  ;;  %v899_v22 = vpack.c.bf16 %v335_v14, %v331_v13 }
  0x8d   : > { %v346_v21 = vld [vmem:[%s1479_s9 + $0x1f8] sm:$0xff]  ;;  %v955_v23 = vpack.c.bf16 %v337_v17, %v333_v15  ;;  %v901_v24 = vpack.c.bf16 %v344_v19, %v340_v18  ;;  %v339_v25 = vld [vmem:[%s1479_s9 + $0x1c0] sm:$0xff]  ;;  %v341_v27 = vld [vmem:[%s1479_s9 + $0x1d0] sm:$0xff] }
  0x8e   : > { %892 = vmatpush1.bf16.msra.mxu0 %v891_v62  ;;  %v343_v26 = vld [vmem:[%s1479_s9 + $0x1e0] sm:$0xff]  ;;  %v957_v28 = vpack.c.bf16 %v346_v21, %v342_v20  ;;  %v345_v29 = vld [vmem:[%s1479_s9 + $0x1f0] sm:$0xff]  ;;  %v348_v30 = vld [vmem:[%s1479_s9 + $0x208] sm:$0xff] }
  0x8f   : > { %948 = vmatpush1.bf16.msra.mxu1 %v947_v63  ;;  %894 = vmatprep.subr.bf16.mxu0 %v893_v0  ;;  %v352_v31 = vld [vmem:[%s1479_s9 + $0x228] sm:$0xff]  ;;  %v350_v32 = vld [vmem:[%s1479_s9 + $0x218] sm:$0xff]  ;;  %v903_v34 = vpack.c.bf16 %v343_v26, %v339_v25  ;;  %v959_v35 = vpack.c.bf16 %v345_v29, %v341_v27  ;;  %v347_v37 = vld [vmem:[%s1479_s9 + $0x200] sm:$0xff] }
  0x90   : > { %950 = vmatprep.subr.bf16.mxu1 %v949_v4  ;;  %v354_v33 = vld [vmem:[%s1479_s9 + $0x238] sm:$0xff]  ;;  %v905_v36 = vpack.c.bf16 %v352_v31, %v348_v30  ;;  %v351_v38 = vld [vmem:[%s1479_s9 + $0x220] sm:$0xff]  ;;  %v349_v39 = vld [vmem:[%s1479_s9 + $0x210] sm:$0xff] }
  0x91   : > { %v961_v40 = vpack.c.bf16 %v354_v33, %v350_v32  ;;  %v353_v41 = vld [vmem:[%s1479_s9 + $0x230] sm:$0xff]  ;;  %v356_v42 = vld [vmem:[%s1479_s9 + $0x248] sm:$0xff]  ;;  %v358_v44 = vld [vmem:[%s1479_s9 + $0x258] sm:$0xff]  ;;  %v907_v46 = vpack.c.bf16 %v351_v38, %v347_v37 }
  0x92   : > { %896 = vmatpush1.bf16.msra.mxu0 %v895_v10  ;;  %v360_v43 = vld [vmem:[%s1479_s9 + $0x268] sm:$0xff]  ;;  %v362_v45 = vld [vmem:[%s1479_s9 + $0x278] sm:$0xff]  ;;  %v963_v47 = vpack.c.bf16 %v353_v41, %v349_v39  ;;  %v355_v49 = vld [vmem:[%s1479_s9 + $0x240] sm:$0xff] }
  0x93   : > { %952 = vmatpush1.bf16.msra.mxu1 %v951_v11  ;;  %898 = vmatprep.subr.bf16.mxu0 %v897_v12  ;;  %v909_v48 = vpack.c.bf16 %v360_v43, %v356_v42  ;;  %v359_v50 = vld [vmem:[%s1479_s9 + $0x260] sm:$0xff]  ;;  %v357_v51 = vld [vmem:[%s1479_s9 + $0x250] sm:$0xff]  ;;  %v965_v52 = vpack.c.bf16 %v362_v45, %v358_v44  ;;  %v364_v54 = vld [vmem:[%s1479_s9 + $0x288] sm:$0xff] }
  0x94   : > { %954 = vmatprep.subr.bf16.mxu1 %v953_v16  ;;  %v361_v53 = vld [vmem:[%s1479_s9 + $0x270] sm:$0xff]  ;;  %v368_v55 = vld [vmem:[%s1479_s9 + $0x2a8] sm:$0xff]  ;;  %v366_v56 = vld [vmem:[%s1479_s9 + $0x298] sm:$0xff]  ;;  %v911_v58 = vpack.c.bf16 %v359_v50, %v355_v49 }
  0x95   : > { %v370_v57 = vld [vmem:[%s1479_s9 + $0x2b8] sm:$0xff]  ;;  %v363_v59 = vld [vmem:[%s1479_s9 + $0x280] sm:$0xff]  ;;  %v967_v60 = vpack.c.bf16 %v361_v53, %v357_v51  ;;  %v913_v61 = vpack.c.bf16 %v368_v55, %v364_v54  ;;  %v365_v63 = vld [vmem:[%s1479_s9 + $0x290] sm:$0xff] }
  0x96   : > { %900 = vmatpush1.bf16.msra.mxu0 %v899_v22  ;;  %v367_v62 = vld [vmem:[%s1479_s9 + $0x2a0] sm:$0xff]  ;;  %v268_v0 = vld [vmem:[#allocation2 + $0x8] sm:$0xff]  ;;  %v969_v1 = vpack.c.bf16 %v370_v57, %v366_v56  ;;  %v369_v2 = vld [vmem:[%s1479_s9 + $0x2b0] sm:$0xff]  ;;  %v397_v56 = vlaneseq }
  0x97   : > { %956 = vmatpush1.bf16.msra.mxu1 %v955_v23  ;;  %902 = vmatprep.subr.bf16.mxu0 %v901_v24  ;;  %v372_v3 = vld [vmem:[%s1479_s9 + $0x2c8] sm:$0xff]  ;;  %v374_v5 = vld [vmem:[%s1479_s9 + $0x2d8] sm:$0xff]  ;;  %v915_v7 = vpack.c.bf16 %v367_v62, %v363_v59  ;;  %v971_v8 = vpack.c.bf16 %v369_v2, %v365_v63  ;;  %v371_v10 = vld [vmem:[%s1479_s9 + $0x2c0] sm:$0xff] }
  0x98   : > { %958 = vmatprep.subr.bf16.mxu1 %v957_v28  ;;  %v376_v4 = vld [vmem:[%s1479_s9 + $0x2e8] sm:$0xff]  ;;  %849 = vmatprep.mubr.msk.f32.mxu0 %vm417_vm0, %v268_v0  ;;  %v378_v6 = vld [vmem:[%s1479_s9 + $0x2f8] sm:$0xff]  ;;  %v375_v11 = vld [vmem:[%s1479_s9 + $0x2e0] sm:$0xff]  ;;  %v398_v57 = vshrl.u32 %v397_v56, 7 }
  0x99   : > { %857 = vmatprep.mubr.msk.f32.mxu1 %vm417_vm0, %v268_v0  ;;  %v917_v9 = vpack.c.bf16 %v376_v4, %v372_v3  ;;  %v373_v12 = vld [vmem:[%s1479_s9 + $0x2d0] sm:$0xff]  ;;  %v973_v13 = vpack.c.bf16 %v378_v6, %v374_v5  ;;  %v380_v15 = vld [vmem:[%s1479_s9 + $0x308] sm:$0xff]  ;;  %v382_v17 = vld [vmem:[%s1479_s9 + $0x318] sm:$0xff]  ;;  %v919_v19 = vpack.c.bf16 %v375_v11, %v371_v10 }
  0x9a   : > { %904 = vmatpush1.bf16.msra.mxu0 %v903_v34  ;;  %v377_v14 = vld [vmem:[%s1479_s9 + $0x2f0] sm:$0xff]  ;;  %v384_v16 = vld [vmem:[%s1479_s9 + $0x328] sm:$0xff]  ;;  %v386_v18 = vld [vmem:[%s1479_s9 + $0x338] sm:$0xff]  ;;  %v411_v62 = vsub.s32 3, %v398_v57 }
  0x9b   : > { %960 = vmatpush1.bf16.msra.mxu1 %v959_v35  ;;  %906 = vmatprep.subr.bf16.mxu0 %v905_v36  ;;  %v975_v20 = vpack.c.bf16 %v377_v14, %v373_v12  ;;  %v921_v21 = vpack.c.bf16 %v384_v16, %v380_v15  ;;  %v379_v22 = vld [vmem:[%s1479_s9 + $0x300] sm:$0xff]  ;;  %v381_v24 = vld [vmem:[%s1479_s9 + $0x310] sm:$0xff]  ;;  %v977_v25 = vpack.c.bf16 %v386_v18, %v382_v17  ;;  %v388_v27 = vld [vmem:[%s1479_s9 + $0x348] sm:$0xff] }
  0x9c   : > { %962 = vmatprep.subr.bf16.mxu1 %v961_v40  ;;  %v383_v23 = vld [vmem:[%s1479_s9 + $0x320] sm:$0xff]  ;;  %v385_v26 = vld [vmem:[%s1479_s9 + $0x330] sm:$0xff]  ;;  %v392_v28 = vld [vmem:[%s1479_s9 + $0x368] sm:$0xff] }
  0x9d   : > { %v390_v29 = vld [vmem:[%s1479_s9 + $0x358] sm:$0xff]  ;;  %v923_v31 = vpack.c.bf16 %v383_v23, %v379_v22  ;;  %v979_v32 = vpack.c.bf16 %v385_v26, %v381_v24  ;;  %v925_v33 = vpack.c.bf16 %v392_v28, %v388_v27  ;;  %v387_v34 = vld [vmem:[%s1479_s9 + $0x340] sm:$0xff]  ;;  %v389_v37 = vld [vmem:[%s1479_s9 + $0x350] sm:$0xff] }
  0x9e   : > { %908 = vmatpush1.bf16.msra.mxu0 %v907_v46  ;;  %v394_v30 = vld [vmem:[%s1479_s9 + $0x378] sm:$0xff]  ;;  %v391_v35 = vld [vmem:[%s1479_s9 + $0x360] sm:$0xff]  ;;  %v393_v38 = vld [vmem:[%s1479_s9 + $0x370] sm:$0xff] }
  0x9f   : > { %964 = vmatpush1.bf16.msra.mxu1 %v963_v47  ;;  %910 = vmatprep.subr.bf16.mxu0 %v909_v48  ;;  %v981_v36 = vpack.c.bf16 %v394_v30, %v390_v29  ;;  %v927_v39 = vpack.c.bf16 %v391_v35, %v387_v34  ;;  %v983_v40 = vpack.c.bf16 %v393_v38, %v389_v37  ;;  %v267_v41 = vld [vmem:[#allocation2] sm:$0xff]  ;;  %v270_v42 = vld [vmem:[#allocation2 + $0x18] sm:$0xff]  ;;  %v269_v43 = vld [vmem:[#allocation2 + $0x10] sm:$0xff] }
  0xa0   : > { %966 = vmatprep.subr.bf16.mxu1 %v965_v52  ;;  %v272_v44 = vld [vmem:[#allocation2 + $0x28] sm:$0xff]  ;;  %v271_v45 = vld [vmem:[#allocation2 + $0x20] sm:$0xff]  ;;  %v274_v46 = vld [vmem:[#allocation2 + $0x38] sm:$0xff] }
  0xa1   : > { %v273_v47 = vld [vmem:[#allocation2 + $0x30] sm:$0xff]  ;;  %v276_v48 = vld [vmem:[#allocation2 + $0x48] sm:$0xff]  ;;  %v275_v49 = vld [vmem:[#allocation2 + $0x40] sm:$0xff] }
  0xa2   : > { %912 = vmatpush1.bf16.msra.mxu0 %v911_v58  ;;  %v278_v50 = vld [vmem:[#allocation2 + $0x58] sm:$0xff]  ;;  %v277_v51 = vld [vmem:[#allocation2 + $0x50] sm:$0xff]  ;;  %v280_v52 = vld [vmem:[#allocation2 + $0x68] sm:$0xff]  ;;  %v399_v58 = vsub.s32 0, %v398_v57 }
  0xa3   : > { %968 = vmatpush1.bf16.msra.mxu1 %v967_v60  ;;  %914 = vmatprep.subr.bf16.mxu0 %v913_v61  ;;  %v279_v53 = vld [vmem:[#allocation2 + $0x60] sm:$0xff]  ;;  %v282_v54 = vld [vmem:[#allocation2 + $0x78] sm:$0xff]  ;;  %v281_v55 = vld [vmem:[#allocation2 + $0x70] sm:$0xff]  ;;  %v407_v60 = vsub.s32 2, %v398_v57  ;;  %v403_v61 = vsub.s32 1, %v398_v57 }
  0xa4   : > { %970 = vmatprep.subr.bf16.mxu1 %v969_v1  ;;  %v395_v59 = vld [vmem:[%s234_s30] sm:$0xf] }
  0xa5   : > { %v1615_v63 = vrot.slane %v395_v59, %v399_v58  ;;  %v1617_v0 = vrot.slane %v395_v59, %v407_v60  ;;  %v1619_v1 = vrot.slane %v395_v59, %v403_v61  ;;  %v1621_v2 = vrot.slane %v395_v59, %v411_v62 }
  0xa6   : > { %916 = vmatpush1.bf16.msra.mxu0 %v915_v7 }
  0xa7   : > { %972 = vmatpush1.bf16.msra.mxu1 %v971_v8  ;;  %918 = vmatprep.subr.bf16.mxu0 %v917_v9 }
  0xa8   : > { %974 = vmatprep.subr.bf16.mxu1 %v973_v13 }
  0xaa   : > { %920 = vmatpush1.bf16.msra.mxu0 %v919_v19 }
  0xab   : > { %976 = vmatpush1.bf16.msra.mxu1 %v975_v20  ;;  %922 = vmatprep.subr.bf16.mxu0 %v921_v21 }
  0xac   : > { %978 = vmatprep.subr.bf16.mxu1 %v977_v25 }
  0xae   : > { %924 = vmatpush1.bf16.msra.mxu0 %v923_v31 }
  0xaf   : > { %980 = vmatpush1.bf16.msra.mxu1 %v979_v32  ;;  %926 = vmatprep.subr.bf16.mxu0 %v925_v33 }
  0xb0   : > { %982 = vmatprep.subr.bf16.mxu1 %v981_v36 }
  0xb2   : > { %928 = vmatpush1.bf16.msra.mxu0 %v927_v39 }
  0xb3   : > { %984 = vmatpush1.bf16.msra.mxu1 %v983_v40 }
  0xb5   : > { %507 = vmatmul.mubr.f32.vlgmr.msra.gmra.mrb[0].mxu0 %v267_v41 }
  0xb6   : > { %620 = vmatmul.mubr.f32.vlgmr.msra.gmra.mrb[0].mxu1 %v267_v41  ;;  %850 = vmatprep.mubr.msk.f32.mxu0 %vm417_vm0, %v270_v42 }
  0xb7   : > { %858 = vmatprep.mubr.msk.f32.mxu1 %vm417_vm0, %v270_v42 }
  0xb9   : > { %513 = vmatmul.mubr.f32.gmra.mrb[2].mxu0 %v269_v43 }
  0xba   : > { %626 = vmatmul.mubr.f32.gmra.mrb[2].mxu1 %v269_v43  ;;  %851 = vmatprep.mubr.msk.f32.mxu0 %vm417_vm0, %v272_v44 }
  0xbb   : > { %859 = vmatprep.mubr.msk.f32.mxu1 %vm417_vm0, %v272_v44 }
  0xbd   : > { %519 = vmatmul.mubr.f32.gmra.mrb[4].mxu0 %v271_v45 }
  0xbe   : > { %632 = vmatmul.mubr.f32.gmra.mrb[4].mxu1 %v271_v45  ;;  %852 = vmatprep.mubr.msk.f32.mxu0 %vm417_vm0, %v274_v46 }
  0xbf   : > { %860 = vmatprep.mubr.msk.f32.mxu1 %vm417_vm0, %v274_v46 }
  0xc1   : > { %525 = vmatmul.mubr.f32.gmra.mrb[6].mxu0 %v273_v47 }
  0xc2   : > { %638 = vmatmul.mubr.f32.gmra.mrb[6].mxu1 %v273_v47  ;;  %853 = vmatprep.mubr.msk.f32.mxu0 %vm417_vm0, %v276_v48 }
  0xc3   : > { %861 = vmatprep.mubr.msk.f32.mxu1 %vm417_vm0, %v276_v48 }
  0xc5   : > { %531 = vmatmul.mubr.f32.gmra.mrb[8].mxu0 %v275_v49 }
  0xc6   : > { %644 = vmatmul.mubr.f32.gmra.mrb[8].mxu1 %v275_v49  ;;  %854 = vmatprep.mubr.msk.f32.mxu0 %vm417_vm0, %v278_v50 }
  0xc7   : > { %862 = vmatprep.mubr.msk.f32.mxu1 %vm417_vm0, %v278_v50 }
  0xc9   : > { %537 = vmatmul.mubr.f32.gmra.mrb[10].mxu0 %v277_v51 }
  0xca   : > { %650 = vmatmul.mubr.f32.gmra.mrb[10].mxu1 %v277_v51  ;;  %855 = vmatprep.mubr.msk.f32.mxu0 %vm417_vm0, %v280_v52 }
  0xcb   : > { %863 = vmatprep.mubr.msk.f32.mxu1 %vm417_vm0, %v280_v52 }
  0xcd   : > { %543 = vmatmul.mubr.f32.gmra.mrb[12].mxu0 %v279_v53 }
  0xce   : > { %656 = vmatmul.mubr.f32.gmra.mrb[12].mxu1 %v279_v53  ;;  %856 = vmatprep.mubr.msk.f32.mxu0 %vm417_vm0, %v282_v54 }
  0xcf   : > { %864 = vmatprep.mubr.msk.f32.mxu1 %vm417_vm0, %v282_v54 }
  0xd1   : > { %549 = vmatmul.mubr.f32.gmra.mrb[14].mxu0 %v281_v55 }
  0xd2   : > { %662 = vmatmul.mubr.f32.gmra.mrb[14].mxu1 %v281_v55 }
 0x188   : > { %v508_v3 = vpop.f32.mrb[0].mxu0 }
 0x189   : > { %v509_v4 = vadd.f32 %v508_v3, %v1615_v63  ;;  %v621_v5 = vpop.f32.mrb[0].mxu1  ;;  %v510_v6 = vpop.f32.mrb[1].mxu0 }
 0x18a   : > { %v622_v7 = vadd.f32 %v621_v5, %v1617_v0  ;;  %v511_v8 = vadd.f32 %v510_v6, %v1619_v1  ;;  %v623_v9 = vpop.f32.mrb[1].mxu1 }
 0x18b   : > { %668 = vst [vmem:[%s1626_s8] sm:$0xff] %v509_v4  ;;  %v624_v10 = vadd.f32 %v623_v9, %v1621_v2 }
 0x18c   : > { %670 = vst [vmem:[%s1626_s8 + $0x10] sm:$0xff] %v622_v7  ;;  %669 = vst [vmem:[%s1626_s8 + $0x8] sm:$0xff] %v511_v8  ;;  %v514_v11 = vpop.f32.mrb[2].mxu0 }
 0x18d   : > { %671 = vst [vmem:[%s1626_s8 + $0x18] sm:$0xff] %v624_v10  ;;  %v515_v12 = vadd.f32 %v514_v11, %v1615_v63  ;;  %v627_v13 = vpop.f32.mrb[2].mxu1  ;;  %v516_v14 = vpop.f32.mrb[3].mxu0 }
 0x18e   : > { %v628_v15 = vadd.f32 %v627_v13, %v1617_v0  ;;  %v517_v16 = vadd.f32 %v516_v14, %v1619_v1  ;;  %v629_v17 = vpop.f32.mrb[3].mxu1 }
 0x18f   : > { %672 = vst [vmem:[%s1626_s8 + $0x20] sm:$0xff] %v515_v12  ;;  %v630_v18 = vadd.f32 %v629_v17, %v1621_v2 }
 0x190   : > { %674 = vst [vmem:[%s1626_s8 + $0x30] sm:$0xff] %v628_v15  ;;  %673 = vst [vmem:[%s1626_s8 + $0x28] sm:$0xff] %v517_v16  ;;  %v520_v19 = vpop.f32.mrb[4].mxu0 }
 0x191   : > { %675 = vst [vmem:[%s1626_s8 + $0x38] sm:$0xff] %v630_v18  ;;  %v521_v20 = vadd.f32 %v520_v19, %v1615_v63  ;;  %v633_v21 = vpop.f32.mrb[4].mxu1  ;;  %v522_v22 = vpop.f32.mrb[5].mxu0 }
 0x192   : > { %v634_v23 = vadd.f32 %v633_v21, %v1617_v0  ;;  %v523_v24 = vadd.f32 %v522_v22, %v1619_v1  ;;  %v635_v25 = vpop.f32.mrb[5].mxu1 }
 0x193   : > { %676 = vst [vmem:[%s1626_s8 + $0x40] sm:$0xff] %v521_v20  ;;  %v636_v26 = vadd.f32 %v635_v25, %v1621_v2 }
 0x194   : > { %678 = vst [vmem:[%s1626_s8 + $0x50] sm:$0xff] %v634_v23  ;;  %677 = vst [vmem:[%s1626_s8 + $0x48] sm:$0xff] %v523_v24  ;;  %v526_v27 = vpop.f32.mrb[6].mxu0 }
 0x195   : > { %679 = vst [vmem:[%s1626_s8 + $0x58] sm:$0xff] %v636_v26  ;;  %v527_v28 = vadd.f32 %v526_v27, %v1615_v63  ;;  %v639_v29 = vpop.f32.mrb[6].mxu1  ;;  %v528_v30 = vpop.f32.mrb[7].mxu0 }
 0x196   : > { %v640_v31 = vadd.f32 %v639_v29, %v1617_v0  ;;  %v529_v32 = vadd.f32 %v528_v30, %v1619_v1  ;;  %v641_v33 = vpop.f32.mrb[7].mxu1 }
 0x197   : > { %680 = vst [vmem:[%s1626_s8 + $0x60] sm:$0xff] %v527_v28  ;;  %v642_v34 = vadd.f32 %v641_v33, %v1621_v2 }
 0x198   : > { %682 = vst [vmem:[%s1626_s8 + $0x70] sm:$0xff] %v640_v31  ;;  %681 = vst [vmem:[%s1626_s8 + $0x68] sm:$0xff] %v529_v32  ;;  %v532_v35 = vpop.f32.mrb[8].mxu0 }
 0x199   : > { %683 = vst [vmem:[%s1626_s8 + $0x78] sm:$0xff] %v642_v34  ;;  %v533_v36 = vadd.f32 %v532_v35, %v1615_v63  ;;  %v645_v37 = vpop.f32.mrb[8].mxu1  ;;  %v534_v38 = vpop.f32.mrb[9].mxu0 }
 0x19a   : > { %v646_v39 = vadd.f32 %v645_v37, %v1617_v0  ;;  %v535_v40 = vadd.f32 %v534_v38, %v1619_v1  ;;  %v647_v41 = vpop.f32.mrb[9].mxu1 }
 0x19b   : > { %684 = vst [vmem:[%s1626_s8 + $0x80] sm:$0xff] %v533_v36  ;;  %v648_v42 = vadd.f32 %v647_v41, %v1621_v2 }
 0x19c   : > { %686 = vst [vmem:[%s1626_s8 + $0x90] sm:$0xff] %v646_v39  ;;  %685 = vst [vmem:[%s1626_s8 + $0x88] sm:$0xff] %v535_v40  ;;  %v538_v43 = vpop.f32.mrb[10].mxu0 }
 0x19d   : > { %687 = vst [vmem:[%s1626_s8 + $0x98] sm:$0xff] %v648_v42  ;;  %v539_v44 = vadd.f32 %v538_v43, %v1615_v63  ;;  %v651_v45 = vpop.f32.mrb[10].mxu1  ;;  %v540_v46 = vpop.f32.mrb[11].mxu0 }
 0x19e   : > { %v652_v47 = vadd.f32 %v651_v45, %v1617_v0  ;;  %v541_v48 = vadd.f32 %v540_v46, %v1619_v1  ;;  %v653_v49 = vpop.f32.mrb[11].mxu1 }
 0x19f   : > { %688 = vst [vmem:[%s1626_s8 + $0xa0] sm:$0xff] %v539_v44  ;;  %v654_v50 = vadd.f32 %v653_v49, %v1621_v2 }
 0x1a0   : > { %690 = vst [vmem:[%s1626_s8 + $0xb0] sm:$0xff] %v652_v47  ;;  %689 = vst [vmem:[%s1626_s8 + $0xa8] sm:$0xff] %v541_v48  ;;  %v544_v51 = vpop.f32.mrb[12].mxu0 }
 0x1a1   : > { %691 = vst [vmem:[%s1626_s8 + $0xb8] sm:$0xff] %v654_v50  ;;  %v545_v52 = vadd.f32 %v544_v51, %v1615_v63  ;;  %v657_v53 = vpop.f32.mrb[12].mxu1  ;;  %v546_v54 = vpop.f32.mrb[13].mxu0 }
 0x1a2   : > { %v658_v55 = vadd.f32 %v657_v53, %v1617_v0  ;;  %v547_v56 = vadd.f32 %v546_v54, %v1619_v1  ;;  %v659_v57 = vpop.f32.mrb[13].mxu1 }
 0x1a3   : > { %692 = vst [vmem:[%s1626_s8 + $0xc0] sm:$0xff] %v545_v52  ;;  %v660_v58 = vadd.f32 %v659_v57, %v1621_v2 }
 0x1a4   : > { %694 = vst [vmem:[%s1626_s8 + $0xd0] sm:$0xff] %v658_v55  ;;  %693 = vst [vmem:[%s1626_s8 + $0xc8] sm:$0xff] %v547_v56  ;;  %v550_v59 = vpop.f32.mrb[14].mxu0 }
 0x1a5   : > { %695 = vst [vmem:[%s1626_s8 + $0xd8] sm:$0xff] %v660_v58  ;;  %v551_v60 = vadd.f32 %v550_v59, %v1615_v63  ;;  %v663_v61 = vpop.f32.mrb[14].mxu1  ;;  %v552_v62 = vpop.f32.mrb[15].mxu0 }
 0x1a6   : > { %v664_v3 = vadd.f32 %v663_v61, %v1617_v0  ;;  %v553_v4 = vadd.f32 %v552_v62, %v1619_v1  ;;  %v665_v5 = vpop.f32.mrb[15].mxu1 }
 0x1a7   : > { %696 = vst [vmem:[%s1626_s8 + $0xe0] sm:$0xff] %v551_v60  ;;  %v666_v63 = vadd.f32 %v665_v5, %v1621_v2 }
 0x1a8   : > { %698 = vst [vmem:[%s1626_s8 + $0xf0] sm:$0xff] %v664_v3  ;;  %697 = vst [vmem:[%s1626_s8 + $0xe8] sm:$0xff] %v553_v4 }
 0x1a9   : > { %699 = vst [vmem:[%s1626_s8 + $0xf8] sm:$0xff] %v666_v63 }
 0x1aa   : > { %1174 = shalt.err (!%p1171_p8)
}
 0x1ab   : > { %s1175_s18 = scalar_lea.hbm %s1687_s21, 4096  ;;  %s1179_s6 = scalar_lea.hbm %s1748_s3, 8192 }
 0x1ac   : > { %p1176_p10 = scmp.ne.s32.totalorder %s1687_s21, %s1175_s18  ;;  %p1180_p3 = scmp.lt.u32.totalorder %s1687_s21, %s1748_s3 }
 0x1ad   : > { %p1181_p2 = scmp.lt.u32.totalorder %s1179_s6, %s1175_s18  ;;  %p1183_p4 = scmp.lt.u32.totalorder %s1175_s18, %s1687_s21 }
 0x1ae   : > { %p1177_p13 = pnand %p1176_p10, %p1773_p6 }
 0x1af   : > { %p1182_p11 = por %p1181_p2, %p1180_p3 }
 0x1b0   : > { %p1178_p7 = pneg %p1177_p13 }
 0x1b1   : > { %p1184_p1 = por %p1183_p4, %p1182_p11 }
 0x1b3   : > { %p1185_p12 = pnand %p1184_p1, %p1178_p7 }
 0x1b5   : > { %1188 = shalt.err (!%p1185_p12)
}
 0x1b6   : > { %s1258_s30 = smov 512   ;;  %s1259_s7 = smov 1024  }
 0x1b7   : > { %s1260_s8 = smov 32  }
 0x1b8   : > { %995 = dma.vmem_to_hbm [thread:$0]  (%p1773_p6), %s1691_s27, 4096, %s1687_s21, %s701_s23, %s1258_s30, %s1259_s7, %s1260_s8  }
 0x1b9 PF: > { %s732_s25 = sand.u32 1, %s1227_s12   ;;  %p1774_p0 = scmp.ne.s32.totalorder %s1763_s4, 0 }
 0x1ba   : > { %p1775_p9 = scmp.ge.s32.totalorder %s1247_s17, 2  ;;  %s733_s22 = scalar_lea.sflag [#allocation4], %s732_s25 }
 0x1bc   : > { %p1009_p5 = pnand %p1775_p9, %p1774_p0 }
 0x1be   : > { %1222 = dma.done.wait (!%p1009_p5), %s733_s22, 4096  }
 0x1bf   : > { %1224 = vsyncadd (!%p1009_p5), %s733_s22, 4294963200  ;;  %s20_s17 = sadd.s32 1, %s1247_s17   ;;  %s1776_s28 = sld [smem:[#allocation12_spill]] }
 0x1c0   : > { %p17_p8 = scmp.ge.s32.totalorder %s20_s17, 4   ;;  %s1777_s12 = smov %s1231_s13 }
 0x1c1   : > { %s1778_s13 = smov %s1235_s14  ;;  %s1779_s14 = smov %s1329_s24 }
 0x1c2   : > { %s1780_s15 = smov %s1243_s16  ;;  %19 = sbr.rel (!%p17_p8) target bundleno = 9 (0x9), region = 94 }
 0x1c5   : > { %s1781_s16 = smov %s1776_s28 }
 0x1c9   :  { %738 = vsyncpa [#allocation3], 1 }
 0x1ca   :  { %740 = vsyncpa [#allocation3 + $0x1], 1 }
 0x1cb   :  { %741 = vsyncpa [#allocation6], 1 }
 0x1cc   :  { %743 = vsyncpa [#allocation6 + $0x1], 1 }
 0x1cd   :  { %744 = vsyncpa [#allocation4], 1 }
 0x1ce   :  { %746 = vsyncpa [#allocation4 + $0x1], 1 }

</bundles_post_ra>
